<compile_context>
chip_gen: v5e
topology: v5e:2x2
jax: 0.10.0
libtpu: 0.0.40
codegen_flags: <defaults>
</compile_context>

<pallas_src>
import functools

import jax
import jax.numpy as jnp
from jax.experimental import pallas as pl
from jax.experimental.pallas import tpu as pltpu


def _round_up(n: int, m: int) -> int:
    return ((n + m - 1) // m) * m


def _linear_kernel(x_ref, w_ref, b_ref, o_ref):
    # MXU matmul (bf16 inputs, f32 accumulation) + f32 bias broadcast on the VPU.
    acc = jnp.dot(x_ref[...], w_ref[...], preferred_element_type=jnp.float32)
    o_ref[...] = (acc + b_ref[...]).astype(o_ref.dtype)


@functools.partial(jax.jit, static_argnames=("tb", "use_bf16"))
def mlp_classifier_forward(x, w_t, b, *, tb=512, use_bf16=True):
    """y = x @ w_t + b (nn.Linear forward) with lane-dense padded Pallas matmul.

    x:   (batch, in_dim)  f32
    w_t: (in_dim, out_dim) f32   -- PyTorch weight (out,in), stored transposed
    b:   (out_dim,)        f32
    """
    batch, in_dim = x.shape
    out_dim = w_t.shape[1]
    out_dtype = x.dtype

    matmul_dtype = jnp.bfloat16 if use_bf16 else x.dtype
    sublane = 16 if use_bf16 else 8

    # Lane-align K and N to 128; sublane-align / tile the batch axis.
    in_p = _round_up(in_dim, 128)
    out_p = _round_up(out_dim, 128)
    tb = _round_up(min(tb, _round_up(batch, sublane)), sublane)
    batch_p = _round_up(batch, tb)

    # Zero-pad (zero K-rows / N-cols contribute nothing to the matmul result).
    x_p = jnp.zeros((batch_p, in_p), matmul_dtype).at[:batch, :in_dim].set(
        x.astype(matmul_dtype))
    w_p = jnp.zeros((in_p, out_p), matmul_dtype).at[:in_dim, :out_dim].set(
        w_t.astype(matmul_dtype))
    b_p = jnp.zeros((1, out_p), jnp.float32).at[0, :out_dim].set(
        b.astype(jnp.float32))

    grid = (batch_p // tb,)
    itemsize = jnp.dtype(matmul_dtype).itemsize
    cost = pl.CostEstimate(
        flops=2 * batch_p * in_p * out_p,
        transcendentals=0,
        bytes_accessed=(batch_p * in_p * itemsize        # x
                        + in_p * out_p * itemsize        # w
                        + out_p * 4                      # b
                        + batch_p * out_p * jnp.dtype(out_dtype).itemsize),
    )

    y_p = pl.pallas_call(
        _linear_kernel,
        out_shape=jax.ShapeDtypeStruct((batch_p, out_p), out_dtype),
        grid_spec=pl.GridSpec(
            grid=grid,
            in_specs=[
                pl.BlockSpec((tb, in_p), lambda i: (i, 0)),       # x tile streams
                pl.BlockSpec((in_p, out_p), lambda i: (0, 0)),    # W resident
                pl.BlockSpec((1, out_p), lambda i: (0, 0)),       # b resident
            ],
            out_specs=pl.BlockSpec((tb, out_p), lambda i: (i, 0)),
        ),
        compiler_params=pltpu.CompilerParams(
            dimension_semantics=("parallel",),   # megacore-shardable batch axis
        ),
        cost_estimate=cost,
    )(x_p, w_p, b_p)

    # Slice padding away (lane-dense compute, exact semantics outside).
    return y_p[:batch, :out_dim]


def init_params(key, input_dim, output_dim):
    """Deterministic init mimicking nn.Linear's uniform(-1/sqrt(in), 1/sqrt(in))."""
    kw, kb = jax.random.split(key)
    bound = 1.0 / jnp.sqrt(jnp.float32(input_dim))
    # PyTorch stores weight as (out, in); keep it transposed as (in, out).
    w_t = jax.random.uniform(kw, (input_dim, output_dim), jnp.float32, -bound, bound)
    b = jax.random.uniform(kb, (output_dim,), jnp.float32, -bound, bound)
    return w_t, b


if __name__ == "__main__":
    key = jax.random.PRNGKey(0)
    k_x, k_p = jax.random.split(key)

    # Small, MLPClassifier-like shapes (graph-level classifier head), chosen so
    # the padded/tiled path exercises multiple grid steps (tb=128 -> grid=(3,)).
    batch, input_dim, output_dim = 300, 64, 7
    x = jax.random.normal(k_x, (batch, input_dim), jnp.float32)
    w_t, b = init_params(k_p, input_dim, output_dim)

    y = mlp_classifier_forward(x, w_t, b, tb=128, use_bf16=True)
    jax.block_until_ready(y)
    assert y.shape == (batch, output_dim)

    # Reference with the same bf16-quantized operands and f32 accumulation.
    xq = x.astype(jnp.bfloat16).astype(jnp.float32)
    wq = w_t.astype(jnp.bfloat16).astype(jnp.float32)
    y_ref = xq @ wq + b
    assert jnp.allclose(y, y_ref, atol=1e-4, rtol=1e-4), (
        float(jnp.max(jnp.abs(y - y_ref))))

    # Also check the full-f32 path (no bf16 cast) against the exact reference.
    y32 = mlp_classifier_forward(x, w_t, b, tb=128, use_bf16=False)
    jax.block_until_ready(y32)
    assert jnp.allclose(y32, x @ w_t + b, atol=1e-5, rtol=1e-5)

    print("KERNEL_OK")
</pallas_src>

<mosaic_0001>
module attributes {stable_mosaic.version = 11 : i64} {
  func.func @_linear_kernel(%arg0: i32, %arg1: memref<128x128xbf16, #tpu.memory_space<vmem>>, %arg2: memref<128x128xbf16, #tpu.memory_space<vmem>>, %arg3: memref<1x128xf32, #tpu.memory_space<vmem>>, %arg4: memref<128x128xf32, #tpu.memory_space<vmem>>) attributes {dimension_semantics = [#tpu.dimension_semantics<parallel>], iteration_bounds = array<i64: 3>, scalar_prefetch = 0 : i64, scratch_operands = 0 : i64, tpu.core_type = #tpu.core_type<tc>, window_params = [{transform_indices = @transform_0, window_bounds = array<i64: 128, 128>}, {pipeline_mode = #tpu.pipeline_mode<synchronous>, transform_indices = @transform_1, window_bounds = array<i64: 128, 128>}, {pipeline_mode = #tpu.pipeline_mode<synchronous>, transform_indices = @transform_2, window_bounds = array<i64: 1, 128>}, {transform_indices = @transform_3, window_bounds = array<i64: 128, 128>}]} {
    %c0 = arith.constant 0 : index
    %c0_0 = arith.constant 0 : index
    %0 = vector.load %arg1[%c0, %c0_0] : memref<128x128xbf16, #tpu.memory_space<vmem>>, vector<128x128xbf16>
    %c0_1 = arith.constant 0 : index
    %c0_2 = arith.constant 0 : index
    %1 = vector.load %arg2[%c0_1, %c0_2] : memref<128x128xbf16, #tpu.memory_space<vmem>>, vector<128x128xbf16>
    %cst = arith.constant dense<0.000000e+00> : vector<128x128xf32>
    %2 = tpu.matmul %0, %1, %cst {dimension_numbers = #tpu.dot_dimension_numbers<[1], [0], [0], [1], [0, 0, 1, 1], [], []>} : vector<128x128xbf16>, vector<128x128xbf16>, vector<128x128xf32> -> vector<128x128xf32>
    %c0_3 = arith.constant 0 : index
    %c0_4 = arith.constant 0 : index
    %3 = vector.load %arg3[%c0_3, %c0_4] : memref<1x128xf32, #tpu.memory_space<vmem>>, vector<1x128xf32>
    %4 = vector.broadcast %3 : vector<1x128xf32> to vector<128x128xf32>
    %5 = arith.addf %2, %4 : vector<128x128xf32>
    %c0_5 = arith.constant 0 : index
    %c0_6 = arith.constant 0 : index
    %6 = vector.load %arg4[%c0_5, %c0_6] : memref<128x128xf32, #tpu.memory_space<vmem>>, vector<128x128xf32>
    tpu.vector_store %arg4[%c0_5, %c0_6], %5 {strides = array<i32>} : memref<128x128xf32, #tpu.memory_space<vmem>>, vector<128x128xf32>,
    return
  }
  func.func @transform_0(%arg0: i32) -> (i32, i32) {
    %c0_i32 = arith.constant 0 : i32
    %c0_i32_0 = arith.constant 0 : i32
    return %arg0, %c0_i32 : i32, i32
  }
  func.func @transform_1(%arg0: i32) -> (i32, i32) {
    %c0_i32 = arith.constant 0 : i32
    %c0_i32_0 = arith.constant 0 : i32
    %c0_i32_1 = arith.constant 0 : i32
    return %c0_i32, %c0_i32_0 : i32, i32
  }
  func.func @transform_2(%arg0: i32) -> (i32, i32) {
    %c0_i32 = arith.constant 0 : i32
    %c0_i32_0 = arith.constant 0 : i32
    %c0_i32_1 = arith.constant 0 : i32
    return %c0_i32, %c0_i32_0 : i32, i32
  }
  func.func @transform_3(%arg0: i32) -> (i32, i32) {
    %c0_i32 = arith.constant 0 : i32
    %c0_i32_0 = arith.constant 0 : i32
    return %arg0, %c0_i32 : i32, i32
  }
}

</mosaic_0001>

<bundles_post_ra>
// kernel: mlp_classifier_forward.1
= control target key start
LH: loop header
LB: loop body
LE: loop exit
PB: predicated region body
PF: predicated region fallthrough
CT: control target
= control target key end

     0   :  { %s579_s12 = smov 0   ;;  %s645_s0 = inlined_call_operand.vmem [shape: bf16[384,128], index: 0, kind: input, shape index: {}]   ;;  %s646_s1 = inlined_call_operand.vmem [shape: bf16[128,128], index: 1, kind: input, shape index: {}]   ;;  %s647_s2 = inlined_call_operand.vmem [shape: f32[1,128], index: 2, kind: input, shape index: {}]   ;;  %s648_s3 = inlined_call_operand.vmem [shape: f32[384,128], index: 3, kind: output, shape index: {}]  }
   0x1 LB: > { %s427_s13 = sadd.s32 4294967295, %s557_s12   ;;  %p431_p0 = scmp.ge.s32.totalorder %s557_s12, 1  ;;  %s557_s12 = sphi %s579_s12, %s13_s12  }
   0x2   : > { %p138_p1 = scmp.lt.s32.totalorder %s557_s12, 4 }
   0x4   : > { %p139_p2 = pnand %p431_p0, %p138_p1 }
   0x5   : > { %s432_s22 = sshll.u32 (!%p139_p2), %s427_s13, 4 }
   0x6   : > { %142 = sbr.rel (%p139_p2) target bundleno = 204 (0xcc), region = 32  ;;  %p163_p3 = scmp.lt.s32.totalorder (!%p139_p2), %s432_s22, 47 }
   0xb   : > { %v517_v0 = vld [vmem:[%s646_s1 + $0x38] sm:$0xff]  ;;  %v516_v1 = vld [vmem:[%s646_s1 + $0x30] sm:$0xff]  ;;  %v515_v2 = vld [vmem:[%s646_s1 + $0x28] sm:$0xff]  ;;  %s650_s22 = smov (!%p163_p3, %s432_s22), 47 }
   0xc   : > { %306 = vmatpush.bf16.msra.mxu0 %v517_v0  ;;  %518 = vmatpush.bf16.msra.mxu1 %v517_v0  ;;  %v514_v3 = vld [vmem:[%s646_s1 + $0x20] sm:$0xff]  ;;  %v513_v4 = vld [vmem:[%s646_s1 + $0x18] sm:$0xff]  ;;  %v512_v5 = vld [vmem:[%s646_s1 + $0x10] sm:$0xff]  ;;  %s433_s29 = sshll.u32 %s650_s22, 2  ;;  %s435_s8 = sshll.u32 %s650_s22, 3 }
   0xd   : > { %519 = vmatpush.bf16.msra.mxu2 %v517_v0  ;;  %520 = vmatpush.bf16.msra.mxu3 %v517_v0  ;;  %v511_v6 = vld [vmem:[%s646_s1 + $0x8] sm:$0xff]  ;;  %v510_v7 = vld [vmem:[%s646_s1] sm:$0xff]  ;;  %s166_s7 = scalar_lea.vmem %s645_s0, %s433_s29  ;;  %s624_s14 = scalar_lea.vmem %s648_s3, %s435_s8 }
   0xe   : > { %v502_v8 = vld [vmem:[%s166_s7] sm:$0xff]  ;;  %v504_v9 = vld [vmem:[%s166_s7 + $0x10] sm:$0xff]  ;;  %v503_v12 = vld [vmem:[%s166_s7 + $0x8] sm:$0xff] }
   0xf   : > { %v506_v10 = vld [vmem:[%s166_s7 + $0x20] sm:$0xff]  ;;  %v508_v11 = vld [vmem:[%s166_s7 + $0x30] sm:$0xff]  ;;  %v505_v13 = vld [vmem:[%s166_s7 + $0x18] sm:$0xff] }
  0x10   : > { %307 = vmatpush.bf16.msra.mxu0 %v516_v1  ;;  %521 = vmatpush.bf16.msra.mxu1 %v516_v1  ;;  %v507_v14 = vld [vmem:[%s166_s7 + $0x28] sm:$0xff]  ;;  %v509_v15 = vld [vmem:[%s166_s7 + $0x38] sm:$0xff]  ;;  %v550_v16 = vld [vmem:[%s647_s2] ss:$0 sm:$0xff] }
  0x11   : > { %522 = vmatpush.bf16.msra.mxu2 %v516_v1  ;;  %523 = vmatpush.bf16.msra.mxu3 %v516_v1 }
  0x14   : > { %308 = vmatpush.bf16.msra.mxu0 %v515_v2  ;;  %524 = vmatpush.bf16.msra.mxu1 %v515_v2 }
  0x15   : > { %525 = vmatpush.bf16.msra.mxu2 %v515_v2  ;;  %526 = vmatpush.bf16.msra.mxu3 %v515_v2 }
  0x18   : > { %309 = vmatpush.bf16.msra.mxu0 %v514_v3  ;;  %527 = vmatpush.bf16.msra.mxu1 %v514_v3 }
  0x19   : > { %528 = vmatpush.bf16.msra.mxu2 %v514_v3  ;;  %529 = vmatpush.bf16.msra.mxu3 %v514_v3 }
  0x1c   : > { %310 = vmatpush.bf16.msra.mxu0 %v513_v4  ;;  %530 = vmatpush.bf16.msra.mxu1 %v513_v4 }
  0x1d   : > { %531 = vmatpush.bf16.msra.mxu2 %v513_v4  ;;  %532 = vmatpush.bf16.msra.mxu3 %v513_v4 }
  0x20   : > { %311 = vmatpush.bf16.msra.mxu0 %v512_v5  ;;  %533 = vmatpush.bf16.msra.mxu1 %v512_v5 }
  0x21   : > { %534 = vmatpush.bf16.msra.mxu2 %v512_v5  ;;  %535 = vmatpush.bf16.msra.mxu3 %v512_v5 }
  0x24   : > { %312 = vmatpush.bf16.msra.mxu0 %v511_v6  ;;  %536 = vmatpush.bf16.msra.mxu1 %v511_v6 }
  0x25   : > { %537 = vmatpush.bf16.msra.mxu2 %v511_v6  ;;  %538 = vmatpush.bf16.msra.mxu3 %v511_v6 }
  0x28   : > { %313 = vmatpush.bf16.msra.mxu0 %v510_v7  ;;  %539 = vmatpush.bf16.msra.mxu1 %v510_v7 }
  0x29   : > { %540 = vmatpush.bf16.msra.mxu2 %v510_v7  ;;  %541 = vmatpush.bf16.msra.mxu3 %v510_v7 }
  0x2b   : > { %314 = vmatmul.bf16.vlgmr.msra.gmra.mxu0 %v502_v8  ;;  %324 = vmatmul.bf16.vlgmr.msra.gmra.mxu1 %v504_v9 }
  0x2c   : > { %334 = vmatmul.bf16.vlgmr.msra.gmra.mxu2 %v506_v10  ;;  %344 = vmatmul.bf16.vlgmr.msra.gmra.mxu3 %v508_v11 }
  0x3b   : > { %319 = vmatmul.bf16.gmra.mxu0 %v503_v12  ;;  %329 = vmatmul.bf16.gmra.mxu1 %v505_v13 }
  0x3c   : > { %339 = vmatmul.bf16.gmra.mxu2 %v507_v14  ;;  %349 = vmatmul.bf16.gmra.mxu3 %v509_v15 }
  0xa8   : > { %v315_v17 = vpop.f32.mrf.mxu0  ;;  %v325_v18 = vpop.f32.mrf.mxu1 }
  0xa9   : > { %v316_v19 = vadd.f32 %v550_v16, %v315_v17  ;;  %v326_v20 = vadd.f32 %v550_v16, %v325_v18 }
  0xab   : > { %355 = vst [vmem:[%s624_s14] sm:$0xff] %v316_v19 }
  0xac   : > { %359 = vst [vmem:[%s624_s14 + $0x20] sm:$0xff] %v326_v20 }
  0xaf   : > { %v335_v21 = vpop.f32.mrf.mxu2  ;;  %v345_v22 = vpop.f32.mrf.mxu3 }
  0xb0   : > { %v336_v23 = vadd.f32 %v550_v16, %v335_v21  ;;  %v346_v24 = vadd.f32 %v550_v16, %v345_v22  ;;  %v317_v25 = vpop.f32.mrf.mxu0  ;;  %v327_v26 = vpop.f32.mrf.mxu1 }
  0xb1   : > { %v318_v27 = vadd.f32 %v550_v16, %v317_v25  ;;  %v328_v28 = vadd.f32 %v550_v16, %v327_v26 }
  0xb2   : > { %363 = vst [vmem:[%s624_s14 + $0x40] sm:$0xff] %v336_v23 }
  0xb3   : > { %367 = vst [vmem:[%s624_s14 + $0x60] sm:$0xff] %v346_v24 }
  0xb4   : > { %356 = vst [vmem:[%s624_s14 + $0x8] sm:$0xff] %v318_v27 }
  0xb5   : > { %360 = vst [vmem:[%s624_s14 + $0x28] sm:$0xff] %v328_v28 }
  0xb7   : > { %v337_v29 = vpop.f32.mrf.mxu2  ;;  %v347_v30 = vpop.f32.mrf.mxu3 }
  0xb8   : > { %v338_v31 = vadd.f32 %v550_v16, %v337_v29  ;;  %v348_v32 = vadd.f32 %v550_v16, %v347_v30  ;;  %v320_v33 = vpop.f32.mrf.mxu0  ;;  %v330_v34 = vpop.f32.mrf.mxu1 }
  0xb9   : > { %v321_v35 = vadd.f32 %v550_v16, %v320_v33  ;;  %v331_v36 = vadd.f32 %v550_v16, %v330_v34 }
  0xba   : > { %364 = vst [vmem:[%s624_s14 + $0x48] sm:$0xff] %v338_v31 }
  0xbb   : > { %368 = vst [vmem:[%s624_s14 + $0x68] sm:$0xff] %v348_v32 }
  0xbc   : > { %357 = vst [vmem:[%s624_s14 + $0x10] sm:$0xff] %v321_v35 }
  0xbd   : > { %361 = vst [vmem:[%s624_s14 + $0x30] sm:$0xff] %v331_v36 }
  0xbf   : > { %v340_v37 = vpop.f32.mrf.mxu2  ;;  %v350_v38 = vpop.f32.mrf.mxu3 }
  0xc0   : > { %v341_v39 = vadd.f32 %v550_v16, %v340_v37  ;;  %v351_v40 = vadd.f32 %v550_v16, %v350_v38  ;;  %v322_v41 = vpop.f32.mrf.mxu0  ;;  %v332_v42 = vpop.f32.mrf.mxu1 }
  0xc1   : > { %v323_v43 = vadd.f32 %v550_v16, %v322_v41  ;;  %v333_v44 = vadd.f32 %v550_v16, %v332_v42 }
  0xc2   : > { %365 = vst [vmem:[%s624_s14 + $0x50] sm:$0xff] %v341_v39 }
  0xc3   : > { %369 = vst [vmem:[%s624_s14 + $0x70] sm:$0xff] %v351_v40 }
  0xc4   : > { %358 = vst [vmem:[%s624_s14 + $0x18] sm:$0xff] %v323_v43 }
  0xc5   : > { %362 = vst [vmem:[%s624_s14 + $0x38] sm:$0xff] %v333_v44 }
  0xc7   : > { %v342_v45 = vpop.f32.mrf.mxu2  ;;  %v352_v46 = vpop.f32.mrf.mxu3 }
  0xc8   : > { %v343_v47 = vadd.f32 %v550_v16, %v342_v45  ;;  %v353_v48 = vadd.f32 %v550_v16, %v352_v46 }
  0xca   : > { %366 = vst [vmem:[%s624_s14 + $0x58] sm:$0xff] %v343_v47 }
  0xcb   : > { %370 = vst [vmem:[%s624_s14 + $0x78] sm:$0xff] %v353_v48 }
  0xcc PF: > { %s13_s12 = sadd.s32 1, %s557_s12  }
  0xcd   : > { %p10_p4 = scmp.ge.s32.totalorder %s13_s12, 5  }
  0xcf   :  { %12 = sbr.rel (!%p10_p4) target bundleno = 1 (0x1), region = 62 }

</bundles_post_ra>
